<compile_context>
chip_gen: v7x
topology: tpu7x:2x2x1
jax: 0.10.0
libtpu: 0.0.40
codegen_flags: <defaults>
</compile_context>

<pallas_src>
import functools

import jax
import jax.numpy as jnp
from jax import lax
from jax.experimental import pallas as pl
from jax.experimental.pallas import tpu as pltpu


def _round_up(a, b):
    return ((a + b - 1) // b) * b


def decoder_kernel(xT_ref, w0_ref, w1_ref, wo_ref, b_ref, bo_ref, o_ref, *,
                   chunk):
    """One grid step: tm points on lanes, channels on sublanes."""
    # Hoisted loads: read once per grid step, reused by every inner chunk.
    w0 = w0_ref[...]                       # (H, Cin)  MXU-stationary
    w1 = w1_ref[...]                       # (H, H)    MXU-stationary
    wo = wo_ref[...]                       # (H, 1)    f32, VPU head
    b0 = b_ref[:, 0:1]                     # (H, 1)    f32
    b1 = b_ref[:, 1:2]                     # (H, 1)    f32
    bo = bo_ref[0, 0]                      # scalar    f32 (SMEM)

    n_chunks = xT_ref.shape[1] // chunk

    def body(c, carry):
        start = pl.multiple_of(c * chunk, chunk)
        xc = xT_ref[:, pl.ds(start, chunk)]                        # (Cin, chunk)
        # Layer 0: (H, Cin) @ (Cin, chunk), f32 accumulate on the MXU.
        h = jnp.dot(w0, xc, preferred_element_type=jnp.float32)    # (H, chunk)
        h = jnp.maximum(h + b0, 0.0)                               # lane-dense VPU
        # Layer 1: (H, H) @ (H, chunk).
        h = jnp.dot(w1, h.astype(w1.dtype),
                    preferred_element_type=jnp.float32)
        h = jnp.maximum(h + b1, 0.0)
        # Output head: the 1-column matmul is a VPU multiply + sublane reduce;
        # the (1, chunk) result is already lane-major -> free unmasked store.
        out = jnp.sum(h * wo, axis=0, keepdims=True) + bo          # (1, chunk)
        o_ref[:, pl.ds(start, chunk)] = out.astype(o_ref.dtype)
        return carry

    lax.fori_loop(0, n_chunks, body, 0, unroll=True)


def decoder_forward(x, params, *, tm=8192, mxu_dtype=jnp.bfloat16):
    """x: (N, in_dim) float32. Returns (N,) float32 SDF values."""
    w0, b0, w1, b1, wo, bo = params        # PyTorch layout: W is (out, in)
    N, in_dim = x.shape
    H = w0.shape[0]

    # Pad the channel (contraction) dim to a multiple of 16 with zero columns:
    # clean bf16 sublane packing for the MXU, contributes nothing numerically.
    cin = _round_up(in_dim, 16)
    if cin != in_dim:
        x = jnp.pad(x, ((0, 0), (0, cin - in_dim)))
        w0 = jnp.pad(w0, ((0, 0), (0, cin - in_dim)))

    # Point tile: large to amortize the ~0.35us per-grid-step overhead, capped
    # near ceil(N/2) so grid >= 2 (megacore split on v7x).
    tm = max(128, min(_round_up(int(tm), 128),
                      _round_up(max(pl.cdiv(N, 2), 128), 128)))
    # Inner lane chunk: keeps the (H, chunk) intermediates resident in vregs.
    if tm % 512 == 0:
        chunk = 512
    elif tm % 256 == 0:
        chunk = 256
    else:
        chunk = 128

    grid = pl.cdiv(N, tm)
    n_pad = grid * tm

    # Wrapper-side relayout: pad N, cast MXU operands, transpose to (Cin, n_pad).
    xT = jnp.pad(x, ((0, n_pad - N), (0, 0))).astype(mxu_dtype).T
    w0_m = w0.astype(mxu_dtype)                               # (H, Cin)
    w1_m = w1.astype(mxu_dtype)                               # (H, H)
    wo_col = wo.reshape(H, 1).astype(jnp.float32)             # (H, 1)
    b01 = jnp.stack([b0, b1], axis=1).astype(jnp.float32)     # (H, 2)
    bo_sc = jnp.asarray(bo, jnp.float32).reshape(1, 1)        # SMEM scalar

    # Right-sized VMEM request: x^T double buffer + output double buffer
    # (1->8 sublane pad) + small weights + headroom.  ~2 MiB at tm=8192.
    item = jnp.dtype(mxu_dtype).itemsize
    vmem_bytes = 2 * (max(cin, 16) * tm * item) + 2 * (8 * tm * 4) + (1 << 20)
    vmem_limit = int(min(max(2 * vmem_bytes, 8 << 20), 32 << 20))

    const = lambda shape: pl.BlockSpec(shape, lambda i: (0, 0))

    out2d = pl.pallas_call(
        functools.partial(decoder_kernel, chunk=chunk),
        out_shape=jax.ShapeDtypeStruct((1, n_pad), jnp.float32),
        grid_spec=pltpu.PrefetchScalarGridSpec(
            num_scalar_prefetch=0,
            grid=(grid,),
            in_specs=[
                pl.BlockSpec((cin, tm), lambda i: (0, i)),          # x^T tile
                const((H, cin)),                                    # W0
                const((H, H)),                                      # W1
                const((H, 1)),                                      # w_out col
                const((H, 2)),                                      # [b0 | b1]
                pl.BlockSpec(memory_space=pltpu.MemorySpace.SMEM),  # b_out
            ],
            out_specs=pl.BlockSpec((1, tm), lambda i: (0, i)),
        ),
        compiler_params=pltpu.CompilerParams(
            dimension_semantics=("parallel",),   # splittable across v7x's 2 TCs
            vmem_limit_bytes=vmem_limit,
        ),
    )(xT, w0_m, w1_m, wo_col, b01, bo_sc)

    # (1, n_pad) lane-major result -> (N,)  (== PyTorch .squeeze(1))
    return out2d.reshape(n_pad)[:N]


def init_params(key, in_dim, hidden):
    """Deterministic PyTorch-Linear-like init; weights in (out, in) layout."""
    ks = jax.random.split(key, 6)

    def lin(kw, kb, fan_in, fan_out):
        bound = float(fan_in) ** -0.5
        w = jax.random.uniform(kw, (fan_out, fan_in), jnp.float32, -bound, bound)
        b = jax.random.uniform(kb, (fan_out,), jnp.float32, -bound, bound)
        return w, b

    w0, b0 = lin(ks[0], ks[1], in_dim, hidden)
    w1, b1 = lin(ks[2], ks[3], hidden, hidden)
    wo, bo = lin(ks[4], ks[5], hidden, 1)
    return (w0, b0, w1, b1, wo.reshape(hidden), bo[0])


def reference_forward(x, params):
    w0, b0, w1, b1, wo, bo = params
    h = jnp.maximum(x @ w0.T + b0, 0.0)
    h = jnp.maximum(h @ w1.T + b1, 0.0)
    return h @ wo + bo   # (N,)


if __name__ == "__main__":
    FEATURE_DIM = 8   # config.feature_dim
    HIDDEN = 32       # config.geo_mlp_hidden_dim (geo_mlp_level = 2)

    key = jax.random.PRNGKey(0)
    kx, kp = jax.random.split(key)
    params = init_params(kp, FEATURE_DIM, HIDDEN)

    # Strict correctness on the f32-MXU path (tile-aligned + ragged tails).
    for n in (256, 200):
        x = jax.random.normal(jax.random.fold_in(kx, n), (n, FEATURE_DIM),
                              jnp.float32)
        out = jax.block_until_ready(
            decoder_forward(x, params, mxu_dtype=jnp.float32))
        ref = reference_forward(x, params)
        assert out.shape == (n,), out.shape
        assert jnp.allclose(out, ref, atol=1e-4, rtol=1e-4), \
            f"f32 mismatch vs reference for N={n}"

    # Default bf16-MXU fast path (review: relaxed tolerance); larger N so the
    # tm=8192 tile, grid>=2 split and the 16-chunk inner loop are exercised.
    for n in (1024, 20000):
        x = jax.random.normal(jax.random.fold_in(kx, n), (n, FEATURE_DIM),
                              jnp.float32)
        out = jax.block_until_ready(decoder_forward(x, params))
        ref = reference_forward(x, params)
        assert out.shape == (n,), out.shape
        assert jnp.allclose(out, ref, atol=5e-2, rtol=5e-2), \
            f"bf16 mismatch vs reference for N={n}"

    # TODO(synk): sea_sdf / time_conditioned_sdf only concat one extra scalar
    # column before layer 0, and occupancy / sem_label_prob add a sigmoid /
    # nclass_out+log_softmax head; not exercised (config defaults are off).
    print("KERNEL_OK")
</pallas_src>

<mosaic_0001>
module attributes {stable_mosaic.version = 11 : i64} {
  func.func @decoder_kernel(%arg0: i32, %arg1: memref<16x128xf32, #tpu.memory_space<vmem>>, %arg2: memref<32x16xf32, #tpu.memory_space<vmem>>, %arg3: memref<32x32xf32, #tpu.memory_space<vmem>>, %arg4: memref<32x1xf32, #tpu.memory_space<vmem>>, %arg5: memref<32x2xf32, #tpu.memory_space<vmem>>, %arg6: memref<1x1xf32, #tpu.memory_space<smem>>, %arg7: memref<1x128xf32, #tpu.memory_space<vmem>>) attributes {dimension_semantics = [#tpu.dimension_semantics<parallel>], iteration_bounds = array<i64: 2>, scalar_prefetch = 0 : i64, scratch_operands = 0 : i64, tpu.core_type = #tpu.core_type<tc>, window_params = [{transform_indices = @transform_0, window_bounds = array<i64: 16, 128>}, {pipeline_mode = #tpu.pipeline_mode<synchronous>, transform_indices = @transform_1, window_bounds = array<i64: 32, 16>}, {pipeline_mode = #tpu.pipeline_mode<synchronous>, transform_indices = @transform_2, window_bounds = array<i64: 32, 32>}, {pipeline_mode = #tpu.pipeline_mode<synchronous>, transform_indices = @transform_3, window_bounds = array<i64: 32, 1>}, {pipeline_mode = #tpu.pipeline_mode<synchronous>, transform_indices = @transform_4, window_bounds = array<i64: 32, 2>}, {transform_indices = @transform_5, window_bounds = array<i64: 1, 1>}, {transform_indices = @transform_6, window_bounds = array<i64: 1, 128>}]} {
    %c0 = arith.constant 0 : index
    %c0_0 = arith.constant 0 : index
    %0 = vector.load %arg2[%c0, %c0_0] : memref<32x16xf32, #tpu.memory_space<vmem>>, vector<32x16xf32>
    %c0_1 = arith.constant 0 : index
    %c0_2 = arith.constant 0 : index
    %1 = vector.load %arg3[%c0_1, %c0_2] : memref<32x32xf32, #tpu.memory_space<vmem>>, vector<32x32xf32>
    %c0_3 = arith.constant 0 : index
    %c0_4 = arith.constant 0 : index
    %2 = vector.load %arg4[%c0_3, %c0_4] : memref<32x1xf32, #tpu.memory_space<vmem>>, vector<32x1xf32>
    %c0_5 = arith.constant 0 : index
    %c0_6 = arith.constant 0 : index
    %3 = vector.load %arg5[%c0_5, %c0_6] : memref<32x2xf32, #tpu.memory_space<vmem>>, vector<32x1xf32>
    %c0_7 = arith.constant 0 : index
    %c1 = arith.constant 1 : index
    %4 = vector.load %arg5[%c0_7, %c1] : memref<32x2xf32, #tpu.memory_space<vmem>>, vector<32x1xf32>
    %c0_8 = arith.constant 0 : index
    %c0_9 = arith.constant 0 : index
    %5 = memref.load %arg6[%c0_8, %c0_9] : memref<1x1xf32, #tpu.memory_space<smem>>
    %c0_i32 = arith.constant 0 : i32
    %c128_i32 = arith.constant 128 : i32
    %6 = arith.muli %c0_i32, %c128_i32 : i32
    %7 = tpu.assume_multiple %6, 128 : i32
    %c0_10 = arith.constant 0 : index
    %8 = arith.index_cast %7 : i32 to index
    %9 = vector.load %arg1[%c0_10, %8] : memref<16x128xf32, #tpu.memory_space<vmem>>, vector<16x128xf32>
    %cst = arith.constant dense<0.000000e+00> : vector<32x128xf32>
    %10 = tpu.matmul %0, %9, %cst {dimension_numbers = #tpu.dot_dimension_numbers<[1], [0], [0], [1], [0, 0, 1, 1], [], []>} : vector<32x16xf32>, vector<16x128xf32>, vector<32x128xf32> -> vector<32x128xf32>
    %11 = vector.broadcast %3 : vector<32x1xf32> to vector<32x128xf32>
    %12 = arith.addf %10, %11 : vector<32x128xf32>
    %cst_11 = arith.constant 0.000000e+00 : f32
    %13 = vector.broadcast %cst_11 : f32 to vector<32x128xf32>
    %14 = arith.maximumf %12, %13 : vector<32x128xf32>
    %cst_12 = arith.constant dense<0.000000e+00> : vector<32x128xf32>
    %15 = tpu.matmul %1, %14, %cst_12 {dimension_numbers = #tpu.dot_dimension_numbers<[1], [0], [0], [1], [0, 0, 1, 1], [], []>} : vector<32x32xf32>, vector<32x128xf32>, vector<32x128xf32> -> vector<32x128xf32>
    %16 = vector.broadcast %4 : vector<32x1xf32> to vector<32x128xf32>
    %17 = arith.addf %15, %16 : vector<32x128xf32>
    %cst_13 = arith.constant 0.000000e+00 : f32
    %18 = vector.broadcast %cst_13 : f32 to vector<32x128xf32>
    %19 = arith.maximumf %17, %18 : vector<32x128xf32>
    %20 = vector.broadcast %2 : vector<32x1xf32> to vector<32x128xf32>
    %21 = arith.mulf %19, %20 : vector<32x128xf32>
    %cst_14 = arith.constant dense<0.000000e+00> : vector<128xf32>
    %22 = vector.multi_reduction <add>, %21, %cst_14 [0] : vector<32x128xf32> to vector<128xf32>
    %23 = vector.shape_cast %22 : vector<128xf32> to vector<1x128xf32>
    %24 = vector.broadcast %5 : f32 to vector<1x128xf32>
    %25 = arith.addf %23, %24 : vector<1x128xf32>
    %c0_15 = arith.constant 0 : index
    %26 = arith.index_cast %7 : i32 to index
    %27 = vector.load %arg7[%c0_15, %26] : memref<1x128xf32, #tpu.memory_space<vmem>>, vector<1x128xf32>
    tpu.vector_store %arg7[%c0_15, %26], %25 {strides = array<i32>} : memref<1x128xf32, #tpu.memory_space<vmem>>, vector<1x128xf32>,
    %c1_i32 = arith.constant 1 : i32
    return
  }
  func.func @transform_0(%arg0: i32) -> (i32, i32) {
    %c0_i32 = arith.constant 0 : i32
    %c0_i32_0 = arith.constant 0 : i32
    return %c0_i32, %arg0 : i32, i32
  }
  func.func @transform_1(%arg0: i32) -> (i32, i32) {
    %c0_i32 = arith.constant 0 : i32
    %c0_i32_0 = arith.constant 0 : i32
    %c0_i32_1 = arith.constant 0 : i32
    return %c0_i32, %c0_i32_0 : i32, i32
  }
  func.func @transform_2(%arg0: i32) -> (i32, i32) {
    %c0_i32 = arith.constant 0 : i32
    %c0_i32_0 = arith.constant 0 : i32
    %c0_i32_1 = arith.constant 0 : i32
    return %c0_i32, %c0_i32_0 : i32, i32
  }
  func.func @transform_3(%arg0: i32) -> (i32, i32) {
    %c0_i32 = arith.constant 0 : i32
    %c0_i32_0 = arith.constant 0 : i32
    %c0_i32_1 = arith.constant 0 : i32
    return %c0_i32, %c0_i32_0 : i32, i32
  }
  func.func @transform_4(%arg0: i32) -> (i32, i32) {
    %c0_i32 = arith.constant 0 : i32
    %c0_i32_0 = arith.constant 0 : i32
    %c0_i32_1 = arith.constant 0 : i32
    return %c0_i32, %c0_i32_0 : i32, i32
  }
  func.func @transform_5(%arg0: i32) -> (i32, i32) {
    %c0_i32 = arith.constant 0 : i32
    %c0_i32_0 = arith.constant 0 : i32
    %c0_i32_1 = arith.constant 0 : i32
    return %c0_i32, %c0_i32_0 : i32, i32
  }
  func.func @transform_6(%arg0: i32) -> (i32, i32) {
    %c0_i32 = arith.constant 0 : i32
    %c0_i32_0 = arith.constant 0 : i32
    return %c0_i32, %arg0 : i32, i32
  }
}

</mosaic_0001>

<bundles_post_ra>
// kernel: tpu_custom_call.1
= control target key start
LH: loop header
LB: loop body
LE: loop exit
PB: predicated region body
PF: predicated region fallthrough
CT: control target
= control target key end

     0   :  { %s1043_s0 = inlined_call_operand.vmem [shape: f32[16,256], index: 0, kind: input, shape index: {}]   ;;  %s1044_s1 = inlined_call_operand.vmem [shape: f32[32,16], index: 1, kind: input, shape index: {}]   ;;  %s1045_s2 = inlined_call_operand.vmem [shape: f32[32,32], index: 2, kind: input, shape index: {}]   ;;  %s1046_s3 = inlined_call_operand.vmem [shape: f32[32,1], index: 3, kind: input, shape index: {}]   ;;  %s1047_s4 = inlined_call_operand.vmem [shape: f32[32,2], index: 4, kind: input, shape index: {}]   ;;  %s1048_s5 = inlined_call_operand.<no memory space> [shape: f32[1,1], index: 5, kind: input, shape index: {}]   ;;  %s1049_s6 = inlined_call_operand.hbm [shape: f32[1,256], index: 6, kind: output, shape index: {}]  }
   0x1   :  { %11 = sst [smem:[#allocation2]] %s1048_s5 }
   0x2   :  { %12 = vsyncpa [#allocation5], 0 }
   0x3   :  { %14 = vsyncpa [#allocation5 + $0x1], 0  ;;  %s877_s23 = smov 0   ;;  %s879_s24 = smov 0  }
   0x4   :  { %s881_s25 = smov 0   ;;  %s883_s26 = smov 0  }
   0x5 LB: > { %s656_s5 = sadd.s32 4294967295, %s834_s26   ;;  %s657_s27 = sadd.s32 4294967294, %s834_s26   ;;  %s834_s26 = sphi %s883_s26, %s1055_s26   ;;  %s830_s25 = sphi %s881_s25, %s1054_s25   ;;  %s826_s24 = sphi %s879_s24, %s1053_s24   ;;  %s822_s23 = sphi %s877_s23, %s1052_s23  }
   0x6   : > { %s900_s28 = sadd.s32 1, %s834_s26   ;;  %s27_s29 = sadd.s32 1, %s830_s25 }
   0x7   : > { %s24_s30 = ssub.s32 %s834_s26, %s900_s28  ;;  %p34_p0 = scmp.ne.s32.totalorder %s830_s25, %s826_s24 }
   0x8   : > { %p25_p1 = scmp.eq.s32.totalorder %s24_s30, 0  ;;  %p35_p2 = scmp.eq.s32.totalorder %s834_s26, 0 }
   0x9   : > { %p169_p3 = scmp.eq.s32.totalorder %s656_s5, 1  ;;  %p174_p4 = scmp.ne.s32.totalorder %s826_s24, %s822_s23 }
   0xa   : > { %s913_s7 = scalar_select %p25_p1, %s830_s25, %s27_s29  }
   0xb   : > { %p36_p5 = por %p35_p2, %p34_p0  ;;  %p915_p6 = por %p169_p3, %p34_p0 }
   0xc   : > { %p175_p7 = scmp.eq.s32.totalorder %s657_s27, 1  ;;  %p659_p9 = scmp.ge.s32.totalorder %s834_s26, 2 }
   0xe   : > { %p919_p8 = por %p175_p7, %p174_p4  ;;  %206 = sbr.rel (%p659_p9) target bundleno = 28 (0x1c), region = 36 }
  0x15   : > { %209 = sbr.rel (!%p36_p5) target bundleno = 28 (0x1c), region = 40  ;;  %s211_s10 = sand.u32 (%p36_p5), 1, %s830_s25  }
  0x16   : > { %s661_s11 = sshll.u32 (%p36_p5), %s834_s26, 3  ;;  %s660_s12 = sshll.u32 (%p36_p5), %s211_s10, 4 }
  0x17   : > { %s215_s15 = scalar_lea.vmem (%p36_p5), %s1043_s0, %s661_s11  ;;  %s213_s16 = scalar_lea.vmem (%p36_p5), [#allocation3], %s660_s12 }
  0x18   : > { %v245_v0 = vld [vmem:[%s215_s15] sm:$0xff] (%p36_p5)  ;;  %v247_v1 = vld [vmem:[%s215_s15 + $0x10] sm:$0xff] (%p36_p5) }
  0x19   : > { %246 = vst [vmem:[%s213_s16] sm:$0xff] (%p36_p5), %v245_v0  ;;  %248 = vst [vmem:[%s213_s16 + $0x8] sm:$0xff] (%p36_p5), %v247_v1 }
  0x1c PF: > { %p662_p10 = scmp.ge.s32.totalorder %s834_s26, 1  ;;  %p253_p11 = scmp.lt.s32.totalorder %s834_s26, 3 }
  0x1e   : > { %p254_p12 = pnand %p662_p10, %p253_p11 }
  0x1f   : > { %s934_s17 = sand.u32 (!%p254_p12), 1, %s826_s24   ;;  %v288_v2 = vld [vmem:[%s1044_s1] sm:$0xff] (!%p254_p12)  ;;  %vm327_vm0 = vcmask (!%p254_p12), 130048   ;;  %v836_v3 = vmov (!%p254_p12), 0   ;;  %v302_v5 = vld [vmem:[%s1047_s4 + $0x10] sm:$0xff] (!%p254_p12)  ;;  %v301_v8 = vld [vmem:[%s1047_s4 + $0x8] sm:$0xff] (!%p254_p12) }
  0x20   : > { %257 = sbr.rel (%p254_p12) target bundleno = 523 (0x20b), region = 78  ;;  %s663_s20 = sshll.u32 (!%p254_p12), %s934_s17, 4  ;;  %693 = vmatprep.mubr.msk.f32.mxu0 (!%p254_p12), %vm327_vm0, %v288_v2  ;;  %766 = vset.pattern.permute.xlu0 (!%p254_p12), %v836_v3  ;;  %v300_v4 = vld [vmem:[%s1047_s4] sm:$0xff] (!%p254_p12)  ;;  %v303_v10 = vld [vmem:[%s1047_s4 + $0x18] sm:$0xff] (!%p254_p12)  ;;  %v289_v11 = vld [vmem:[%s1044_s1 + $0x8] sm:$0xff] (!%p254_p12)  ;;  %vm445_vm1 = vcmask (!%p254_p12), 261120  }
  0x21   : > { %309 = vperm.xlu0 (!%p254_p12), %766, %v300_v4   ;;  %767 = vset.pattern.permute.xlu1 (!%p254_p12), %v836_v3  ;;  %s262_s30 = scalar_lea.vmem (!%p254_p12), [#allocation3], %s663_s20  ;;  %v290_v12 = vld [vmem:[%s1044_s1 + $0x10] sm:$0xff] (!%p254_p12)  ;;  %v291_v13 = vld [vmem:[%s1044_s1 + $0x18] sm:$0xff] (!%p254_p12)  ;;  %v292_v14 = vld [vmem:[%s1045_s2] sm:$0xff] (!%p254_p12)  ;;  %v837_v15 = vmov (!%p254_p12), 1   ;;  %s304_s22 = sld [smem:[#allocation2]] (!%p254_p12) }
  0x22   : > { %v305_v6 = vld [vmem:[%s262_s30] sm:$0xff] (!%p254_p12)  ;;  %v306_v7 = vld [vmem:[%s262_s30 + $0x8] sm:$0xff] (!%p254_p12)  ;;  %319 = vperm.xlu1 (!%p254_p12), %767, %v302_v5   ;;  %707 = vmatprep.mubr.msk.f32.mxu1 (!%p254_p12), %vm445_vm1, %v292_v14  ;;  %s672_s27 = sshll.u32 (!%p254_p12), %s656_s5, 4  ;;  %s287_s29 = scalar_lea.vmem (!%p254_p12), [#allocation4], %s934_s17 }
  0x23   : > { %v713_v9 = vpack.c.bf16 (!%p254_p12), %v306_v7, %v305_v6  ;;  %v296_v16 = vld [vmem:[%s1046_s3] sm:$0xff] (!%p254_p12)  ;;  %v297_v17 = vld [vmem:[%s1046_s3 + $0x8] sm:$0xff] (!%p254_p12)  ;;  %v298_v18 = vld [vmem:[%s1046_s3 + $0x10] sm:$0xff] (!%p254_p12)  ;;  %s596_s30 = sshll.u32 (!%p254_p12), %s287_s29, 4  ;;  %s999_s12 = scalar_lea.hbm (!%p254_p12), %s1049_s6, %s672_s27  ;;  %s1001_s30 = int_to_ptr.vmem [resolvable:$true] %s596_s30 }
  0x24   : > { %v299_v19 = vld [vmem:[%s1046_s3 + $0x18] sm:$0xff] (!%p254_p12)  ;;  %v293_v38 = vld [vmem:[%s1045_s2 + $0x8] sm:$0xff] (!%p254_p12)  ;;  %v294_v39 = vld [vmem:[%s1045_s2 + $0x10] sm:$0xff] (!%p254_p12)  ;;  %s584_s13 = scalar_lea.sflag (!%p254_p12), [#allocation5], %s934_s17  ;;  %s772_s14 = scalar_lea.vmem (!%p254_p12), %s1001_s30, 16 }
  0x25   : > { %714 = vmatprep.subr.bf16.mxu0 (!%p254_p12), %v713_v9  ;;  %314 = vperm.xlu0 (!%p254_p12), %766, %v301_v8   ;;  %v295_v40 = vld [vmem:[%s1045_s2 + $0x18] sm:$0xff] (!%p254_p12)  ;;  %p773_p13 = scmp.ne.s32.totalorder (!%p254_p12), %s1001_s30, %s772_s14  ;;  %s838_s5 = smov (!%p254_p12), [#allocation4]  }
  0x26   : > { %716 = vmatpush3.bf16.msra.mxu0 (!%p254_p12), %v713_v9  ;;  %324 = vperm.xlu1 (!%p254_p12), %767, %v303_v10   ;;  %s776_s15 = sshll.u32 (!%p254_p12), %s838_s5, 4  ;;  %s777_s15 = int_to_ptr.vmem [resolvable:$false] %s776_s15 }
  0x27   : > { %v580_v9 = vstv %s304_s22  ;;  %p774_p0 = pnand %p773_p13, %p915_p6  ;;  %s778_s16 = scalar_lea.vmem %s777_s15, 32 }
  0x28   : > { %p779_p2 = scmp.lt.s32.totalorder %s1001_s30, %s777_s15  ;;  %p780_p3 = scmp.lt.s32.totalorder %s778_s16, %s772_s14 }
  0x29   : > { %694 = vmatmul.mubr.msk.f32.vlgmr.msra.gmra.mrb[0].mxu0 %vm327_vm0, %v289_v11  ;;  %768 = vset.pattern.permute.xlu0 %v837_v15  ;;  %p775_p1 = pneg %p774_p0 }
  0x2a   : > { %696 = vmatprep.mubr.msk.f32.mxu0 %vm327_vm0, %v290_v12  ;;  %769 = vset.pattern.permute.xlu1 %v837_v15  ;;  %p781_p4 = por %p780_p3, %p779_p2 }
  0x2b   : > { %434 = vperm.xlu1 %769, %v301_v8   ;;  %430 = vperm.xlu0 %768, %v300_v4  }
  0x2c   : > { %p782_p5 = pnand %p781_p4, %p775_p1 }
  0x2d   : > { %697 = vmatmul.mubr.msk.f32.gmra.mrb[2].mxu0 %vm327_vm0, %v291_v13 }
  0x2f   : > { %438 = vperm.xlu1 %769, %v302_v5   ;;  %442 = vperm.xlu0 %768, %v303_v10  }
  0x33   : > { %770 = vset.pattern.permute.xlu1 %v836_v3  ;;  %771 = vset.pattern.permute.xlu0 %v836_v3 }
  0x34   : > { %549 = vperm.xlu1 %770, %v296_v16   ;;  %554 = vperm.xlu0 %771, %v297_v17  }
  0x38   : > { %559 = vperm.xlu1 %770, %v298_v18  }
  0x3c   : > { %564 = vperm.xlu1 %770, %v299_v19  }
  0xa0   : > { %v310_v20 = vpop.permute.xlu0 %309 }
  0xa1   : > { %v320_v21 = vpop.permute.xlu1 %319 }
  0xa4   : > { %v315_v22 = vpop.permute.xlu0 %314 }
  0xa5   : > { %v325_v28 = vpop.permute.xlu1 %324 }
  0xaa   : > { %v435_v41 = vpop.permute.xlu1 %434  ;;  %v431_v42 = vpop.permute.xlu0 %430 }
  0xae   : > { %v439_v43 = vpop.permute.xlu1 %438  ;;  %v443_v44 = vpop.permute.xlu0 %442 }
  0xb3   : > { %v550_v45 = vpop.permute.xlu1 %549  ;;  %v555_v50 = vpop.permute.xlu0 %554 }
  0xb7   : > { %v560_v54 = vpop.permute.xlu1 %559 }
  0xbb   : > { %v565_v0 = vpop.permute.xlu1 %564 }
  0xfc   : > { %v695_v23 = vpop.f32.mrb[0].mxu0 }
  0xfd   : > { %v412_v24 = vadd.f32 %v695_v23, %v315_v22  ;;  %v406_v25 = vpop.f32.mrb[1].mxu0 }
  0xfe   : > { %v407_v26 = vadd.f32 %v406_v25, %v310_v20 }
  0xff   : > { %v426_v27 = vmax.f32 %v412_v24, 0.0 }
 0x100   : > { %v425_v29 = vmax.f32 %v407_v26, 0.0  ;;  %v698_v30 = vpop.f32.mrb[2].mxu0 }
 0x101   : > { %v422_v31 = vadd.f32 %v698_v30, %v325_v28  ;;  %v416_v32 = vpop.f32.mrb[3].mxu0 }
 0x102   : > { %v417_v33 = vadd.f32 %v416_v32, %v320_v21  ;;  %v717_v34 = vpack.c.bf16 %v426_v27, %v425_v29 }
 0x103   : > { %v428_v35 = vmax.f32 %v422_v31, 0.0 }
 0x104   : > { %v427_v36 = vmax.f32 %v417_v33, 0.0  ;;  %718 = vmatprep.subr.bf16.mxu1 %v717_v34 }
 0x105   : > { %720 = vmatpush3.bf16.msra.mxu1 %v717_v34 }
 0x106   : > { %v721_v37 = vpack.c.bf16 %v428_v35, %v427_v36 }
 0x108   : > { %722 = vmatprep.subr.bf16.mxu1 %v721_v37 }
 0x109   : > { %724 = vmatpush3.bf16.msra.mxu1 %v721_v37 }
 0x10c   : > { %708 = vmatmul.mubr.msk.f32.vlgmr.msra.gmra.mrb[0].mxu1 %vm445_vm1, %v293_v38 }
 0x10d   : > { %710 = vmatprep.mubr.msk.f32.mxu1 %vm445_vm1, %v294_v39 }
 0x110   : > { %711 = vmatmul.mubr.msk.f32.gmra.mrb[2].mxu1 %vm445_vm1, %v295_v40 }
 0x1df   : > { %v709_v46 = vpop.f32.mrb[0].mxu1 }
 0x1e0   : > { %v530_v47 = vadd.f32 %v709_v46, %v435_v41  ;;  %v524_v48 = vpop.f32.mrb[1].mxu1 }
 0x1e1   : > { %v525_v49 = vadd.f32 %v524_v48, %v431_v42 }
 0x1e2   : > { %v544_v51 = vmax.f32 %v530_v47, 0.0 }
 0x1e3   : > { %v543_v52 = vmax.f32 %v525_v49, 0.0  ;;  %v712_v53 = vpop.f32.mrb[2].mxu1 }
 0x1e4   : > { %v568_v55 = vmul.f32 %v555_v50, %v544_v51  ;;  %v540_v56 = vadd.f32 %v712_v53, %v443_v44  ;;  %v534_v57 = vpop.f32.mrb[3].mxu1 }
 0x1e5   : > { %v567_v58 = vmul.f32 %v550_v45, %v543_v52  ;;  %v535_v59 = vadd.f32 %v534_v57, %v439_v43 }
 0x1e6   : > { %v546_v61 = vmax.f32 %v540_v56, 0.0 }
 0x1e7   : > { %v571_v60 = vadd.f32 %v568_v55, %v567_v58  ;;  %v545_v62 = vmax.f32 %v535_v59, 0.0 }
 0x1e8   : > { %v570_v1 = vmul.f32 %v565_v0, %v546_v61 }
 0x1e9   : > { %v569_v63 = vmul.f32 %v560_v54, %v545_v62 }
 0x1eb   : > { %v572_v2 = vadd.f32 %v571_v60, %v569_v63 }
 0x1ed   : > { %v573_v3 = vadd.f32 %v572_v2, %v570_v1 }
 0x1ef   : > { %v574_v4 = vrot.slane %v573_v3, 4 }
 0x1f1   : > { %v575_v5 = vadd.f32 %v574_v4, %v573_v3 }
 0x1f3   : > { %v576_v6 = vrot.slane %v575_v5, 2 }
 0x1f5   : > { %v577_v7 = vadd.f32 %v576_v6, %v575_v5 }
 0x1f7   : > { %v578_v8 = vrot.slane %v577_v7, 1 }
 0x1f9   : > { %v579_v10 = vadd.f32 %v578_v8, %v577_v7 }
 0x1fb   : > { %v581_v11 = vadd.f32 %v580_v9, %v579_v10 }
 0x1fd   : > { %582 = vst [vmem:[%s287_s29] sm:$0x1] %v581_v11 }
 0x1fe   : > { %785 = shalt.err (!%p782_p5)
}
 0x1ff   : > { %s786_s17 = scalar_lea.hbm %s999_s12, 16  ;;  %s790_s20 = scalar_lea.hbm %s1049_s6, 32 }
 0x200   : > { %p787_p7 = scmp.ne.s32.totalorder %s999_s12, %s786_s17  ;;  %p791_p12 = scmp.lt.u32.totalorder %s999_s12, %s1049_s6 }
 0x201   : > { %p792_p13 = scmp.lt.u32.totalorder %s790_s20, %s786_s17  ;;  %p794_p1 = scmp.lt.u32.totalorder %s786_s17, %s999_s12 }
 0x202   : > { %p788_p10 = pnand %p787_p7, %p915_p6 }
 0x203   : > { %p793_p0 = por %p792_p13, %p791_p12 }
 0x204   : > { %p789_p11 = pneg %p788_p10 }
 0x205   : > { %p795_p2 = por %p794_p1, %p793_p0 }
 0x207   : > { %p796_p3 = pnand %p795_p2, %p789_p11 }
 0x209   : > { %799 = shalt.err (!%p796_p3)
}
 0x20a   : > { %725 = dma.vmem_to_hbm [thread:$0]  (%p915_p6), %s1001_s30, 16, %s999_s12, %s584_s13  }
 0x20b PF: > { %s608_s27 = sand.u32 1, %s822_s23   ;;  %p728_p4 = pnand %p659_p9, %p919_p8 }
 0x20c   : > { %s609_s29 = scalar_lea.sflag [#allocation5], %s608_s27 }
 0x20d   : > { %817 = dma.done.wait (!%p728_p4), %s609_s29, 16  }
 0x20e   : > { %819 = vsyncadd (!%p728_p4), %s609_s29, 4294967280  ;;  %p17_p5 = scmp.ge.s32.totalorder %s900_s28, 4   ;;  %s1052_s23 = smov %s826_s24 }
 0x20f   : > { %s1053_s24 = smov %s830_s25  ;;  %s1054_s25 = smov %s913_s7 }
 0x210   : > { %s1055_s26 = smov %s900_s28  ;;  %19 = sbr.rel (!%p17_p5) target bundleno = 5 (0x5), region = 122 }
 0x217   :  { %613 = vsyncpa [#allocation5], 1 }
 0x218   :  { %615 = vsyncpa [#allocation5 + $0x1], 1 }

</bundles_post_ra>
